<compile_context>
chip_gen: v6e
topology: v6e:2x2x1
jax: 0.10.0
libtpu: 0.0.40
codegen_flags: <defaults>
</compile_context>

<pallas_src>
import math
import functools

import jax
import jax.numpy as jnp
from jax.experimental import pallas as pl
from jax.experimental.pallas import tpu as pltpu


def _dgmmc_kernel(x_ref, w_ref, bias_ref, out_ref, *, nb_components, cp):
    """One batch tile.

    Shapes inside the kernel (TB = batch tile, lanes):
      x_ref    : (TB, D)      feature tile, native dtype
      w_ref    : (M*Cp, 2D)   stacked [ -0.5/band | mu/band ], component-major rows
      bias_ref : (M*Cp, 1)    fused constant (+ log mixture weight + log prior)
      out_ref  : (C, TB)      class log-posteriors for this tile
    """
    M = nb_components
    # Cast after the DMA (keeps HBM traffic in the native dtype) and transpose
    # in-VMEM so the batch sits on the lane axis for everything downstream.
    xT = x_ref[...].astype(jnp.float32).T                       # (D, TB)
    rhs = jnp.concatenate([xT * xT, xT], axis=0)                # (2D, TB)

    # Single stacked matmul: all components & classes at once.
    lp = jnp.dot(w_ref[...], rhs,
                 preferred_element_type=jnp.float32)            # (M*Cp, TB)
    lp = lp + bias_ref[...]                                     # lane-broadcast add

    if M > 1:
        # Per-class logsumexp over mixture components (rows are m*Cp + c, so
        # the sublane-aligned regroup is (M, Cp, TB); reduce over the page axis).
        lp3 = lp.reshape(M, cp, lp.shape[-1])
        cmax = jnp.max(lp3, axis=0)                             # (Cp, TB)
        log_cls = cmax + jnp.log(jnp.sum(jnp.exp(lp3 - cmax), axis=0))
    else:
        log_cls = lp                                            # (Cp, TB)

    # Normalize over classes (padded class rows are ~-1e30 -> contribute 0).
    m = jnp.max(log_cls, axis=0, keepdims=True)                 # (1, TB)
    lse = m + jnp.log(jnp.sum(jnp.exp(log_cls - m), axis=0, keepdims=True))
    res = log_cls - lse                                         # (Cp, TB)

    out_ref[...] = res[:out_ref.shape[0], :].astype(out_ref.dtype)


def _pick_block_b(batch, desired, feat_dim, x_itemsize):
    """Lane-dense batch tile: multiple of 128, VMEM-budgeted (safe for v7x's
    smaller scoped VMEM), and >= 2 grid steps when the batch allows so both
    v7x TensorCores get work on the 'parallel' grid axis."""
    budget = 24 << 20                                    # conservative bytes
    per_col = feat_dim * (2 * x_itemsize + 16) + 256     # x dbl-buffer + f32 temps
    cap = max(128, (budget // per_col) // 128 * 128)
    bb = max(128, min(desired, cap) // 128 * 128)
    if batch > 128:                                      # allow >= 2 grid steps
        half = -(-batch // 2)
        bb = min(bb, max(128, -(-half // 128) * 128))
    bb = min(bb, -(-batch // 128) * 128)                 # don't exceed padded B
    return bb


def dgmmc_diagonal_forward(x, means, bandwidths, priors, weights,
                           nb_classes, nb_components, *, block_b=1024):
    """JAX wrapper: apply_constraints() + parameter folding + pallas_call.

    x          : (B, D)    flat feature vectors (any float dtype)
    means      : (C*M, D)  row k -> class k // M, component k % M
    bandwidths : (C*M, D)  diagonal covariances
    priors     : (C,)      class prior logits
    weights    : (C*M,)    mixture weight logits (ignored when M == 1)
    returns    : (B, C)    class log-posteriors (log_mixture)
    """
    B, D = x.shape
    C, M = nb_classes, nb_components
    assert means.shape == (C * M, D) and bandwidths.shape == (C * M, D)

    f32 = jnp.float32
    band = jnp.clip(bandwidths.astype(f32), 1e-6, 1000.0)
    inv = 1.0 / band
    mu = means.astype(f32)

    # apply_constraints(): parameter-only transforms kept in plain JAX.
    priors_prob = jax.nn.softmax(priors.astype(f32), axis=0) + 1e-6
    log_prior = jnp.log(priors_prob)                          # (C,)
    if M > 1:
        w = jax.nn.softmax(weights.astype(f32).reshape(C, M), axis=1) + 1e-6
        log_w = jnp.log(w).reshape(C * M)                     # class-major k = c*M + m
    else:
        log_w = jnp.zeros((C * M,), f32)

    # Fused per-row constant of the diagonal-Gaussian density, plus the log
    # mixture weight and the log class prior (prior is constant over the
    # components of a class, so folding it before the component-LSE is exact).
    # TODO(synk): for bandwidths near the 1e-6 clip the x^2-expansion of
    # (x-mu)^2/band cancels badly in f32; compute these sums in higher
    # precision / keep a direct-difference path if that regime matters.
    const = f32(D * math.log(2.0 * math.pi))
    bias_k = (-0.5 * (const
                      + jnp.sum(jnp.log(band), axis=1)
                      + jnp.sum(mu * mu * inv, axis=1))
              + log_w
              + jnp.repeat(log_prior, M))                     # (C*M,), class-major

    # Stacked weights: columns [0:D) multiply x^2, columns [D:2D) multiply x.
    W_cm = jnp.concatenate([-0.5 * inv, mu * inv], axis=1)    # (C*M, 2D)

    # Reorder class-major rows (c*M + m) -> component-major (m*Cp + c), with
    # classes padded to a sublane-aligned Cp so the in-kernel regroup is free.
    Cp = ((C + 7) // 8) * 8 if M > 1 else C
    NEG = f32(-1e30)

    def regroup(t, fill):
        X = t.shape[-1]
        t = t.reshape(C, M, X).transpose(1, 0, 2)             # (M, C, X)
        if Cp != C:
            pad = jnp.full((M, Cp - C, X), fill, f32)
            t = jnp.concatenate([t, pad], axis=1)
        return t.reshape(M * Cp, X)

    W = regroup(W_cm, 0.0)                                    # (M*Cp, 2D)
    bias = regroup(bias_k[:, None], NEG)                      # (M*Cp, 1)

    bb = _pick_block_b(B, block_b, D, jnp.dtype(x.dtype).itemsize)
    grid = (pl.cdiv(B, bb),)
    # TODO(synk): if C grows to hundreds+, add a class-tiling grid axis (or
    # shrink bb) so the (Cp, TB) live tiles stay small.

    kernel = functools.partial(_dgmmc_kernel, nb_components=M, cp=Cp)
    out_cb = pl.pallas_call(
        kernel,
        out_shape=jax.ShapeDtypeStruct((C, B), f32),
        grid_spec=pltpu.PrefetchScalarGridSpec(
            num_scalar_prefetch=0,
            grid=grid,
            in_specs=[
                pl.BlockSpec((bb, D), lambda i: (i, 0)),            # x tile (native dtype)
                pl.BlockSpec((M * Cp, 2 * D), lambda i: (0, 0)),    # stacked weights
                pl.BlockSpec((M * Cp, 1), lambda i: (0, 0)),        # fused bias
            ],
            out_specs=pl.BlockSpec((C, bb), lambda i: (0, i)),      # lane-dense (C, TB)
        ),
        compiler_params=pltpu.CompilerParams(
            dimension_semantics=("parallel",)),
    )(x, W, bias)

    # Tiny (C, B) transpose only to honor the module's (B, C) return contract.
    return out_cb.T


def _reference(x, means, bandwidths, priors, weights, C, M):
    """Pure-JAX reference mirroring the PyTorch forward()."""
    B, D = x.shape
    band = jnp.clip(bandwidths, 1e-6, 1000.0)
    log = -0.5 * (D * math.log(2.0 * math.pi)
                  + jnp.sum(jnp.log(band), axis=1)[None, :]
                  + jnp.sum((x[:, None, :] - means[None]) ** 2 / band[None],
                            axis=-1))                                # (B, C*M)
    if M > 1:
        w = jax.nn.softmax(weights.reshape(C, M), axis=1) + 1e-6
        log = log + jnp.log(w.reshape(-1))[None, :]
        log = jax.scipy.special.logsumexp(log.reshape(B, C, M), axis=2)
    pp = jax.nn.softmax(priors, axis=0) + 1e-6
    log = log + jnp.log(pp)[None, :]
    return log - jax.scipy.special.logsumexp(log, axis=1, keepdims=True)


if __name__ == "__main__":
    # Small shapes consistent with the module: flat feature vectors.
    B, D = 16, 32            # batch, features_dim
    C, M = 4, 2              # nb_classes, nb_components
    K = C * M

    key = jax.random.PRNGKey(0)
    k_means, k_x = jax.random.split(key)

    means = jax.random.normal(k_means, (K, D), dtype=jnp.float32)
    bandwidths = 0.15 * jnp.ones((K, D), dtype=jnp.float32)
    priors = jnp.ones((C,), dtype=jnp.float32) / C
    weights = jnp.ones((K,), dtype=jnp.float32) / M

    x = jax.random.normal(k_x, (B, D), dtype=jnp.float32)

    out = dgmmc_diagonal_forward(x, means, bandwidths, priors, weights,
                                 nb_classes=C, nb_components=M)
    out = jax.block_until_ready(out)

    ref = _reference(x, means, bandwidths, priors, weights, C, M)
    assert out.shape == (B, C)
    err = float(jnp.max(jnp.abs(out - ref)))
    # The MXU formulation expands (x-mu)^2, carrying a little extra f32
    # rounding vs the direct-difference reference; 1e-3 still catches any real
    # bug (ordering / weights / prior / normalization) by orders of magnitude.
    assert jnp.allclose(out, ref, rtol=1e-3, atol=1e-3), \
        f"max abs diff = {err}"

    print("KERNEL_OK")
</pallas_src>

<mosaic_0001>
module attributes {stable_mosaic.version = 11 : i64} {
  func.func @_dgmmc_kernel(%arg0: i32, %arg1: memref<128x32xf32, #tpu.memory_space<vmem>>, %arg2: memref<16x64xf32, #tpu.memory_space<vmem>>, %arg3: memref<16x1xf32, #tpu.memory_space<vmem>>, %arg4: memref<4x128xf32, #tpu.memory_space<vmem>>) attributes {dimension_semantics = [#tpu.dimension_semantics<parallel>], iteration_bounds = array<i64: 1>, scalar_prefetch = 0 : i64, scratch_operands = 0 : i64, tpu.core_type = #tpu.core_type<tc>, window_params = [{transform_indices = @transform_0, window_bounds = array<i64: 128, 32>}, {pipeline_mode = #tpu.pipeline_mode<synchronous>, transform_indices = @transform_1, window_bounds = array<i64: 16, 64>}, {pipeline_mode = #tpu.pipeline_mode<synchronous>, transform_indices = @transform_2, window_bounds = array<i64: 16, 1>}, {transform_indices = @transform_3, window_bounds = array<i64: 4, 128>}]} {
    %c0 = arith.constant 0 : index
    %c0_0 = arith.constant 0 : index
    %0 = vector.load %arg1[%c0, %c0_0] : memref<128x32xf32, #tpu.memory_space<vmem>>, vector<128x32xf32>
    %1 = tpu.transpose %0, [1, 0] : vector<128x32xf32> -> vector<32x128xf32>
    %2 = arith.mulf %1, %1 : vector<32x128xf32>
    %3 = tpu.concatenate %2, %1 in 0 : vector<32x128xf32>, vector<32x128xf32> -> vector<64x128xf32>
    %c0_1 = arith.constant 0 : index
    %c0_2 = arith.constant 0 : index
    %4 = vector.load %arg2[%c0_1, %c0_2] : memref<16x64xf32, #tpu.memory_space<vmem>>, vector<16x64xf32>
    %cst = arith.constant dense<0.000000e+00> : vector<16x128xf32>
    %5 = tpu.matmul %4, %3, %cst {dimension_numbers = #tpu.dot_dimension_numbers<[1], [0], [0], [1], [0, 0, 1, 1], [], []>} : vector<16x64xf32>, vector<64x128xf32>, vector<16x128xf32> -> vector<16x128xf32>
    %c0_3 = arith.constant 0 : index
    %c0_4 = arith.constant 0 : index
    %6 = vector.load %arg3[%c0_3, %c0_4] : memref<16x1xf32, #tpu.memory_space<vmem>>, vector<16x1xf32>
    %7 = vector.broadcast %6 : vector<16x1xf32> to vector<16x128xf32>
    %8 = arith.addf %5, %7 : vector<16x128xf32>
    %9 = vector.shape_cast %8 : vector<16x128xf32> to vector<2x8x128xf32>
    %cst_5 = arith.constant dense<0xFF800000> : vector<8x128xf32>
    %10 = vector.multi_reduction <maximumf>, %9, %cst_5 [0] : vector<2x8x128xf32> to vector<8x128xf32>
    %11 = vector.shape_cast %10 : vector<8x128xf32> to vector<1x8x128xf32>
    %12 = vector.broadcast %11 : vector<1x8x128xf32> to vector<2x8x128xf32>
    %13 = arith.subf %9, %12 : vector<2x8x128xf32>
    %14 = math.exp %13 : vector<2x8x128xf32>
    %cst_6 = arith.constant dense<0.000000e+00> : vector<8x128xf32>
    %15 = vector.multi_reduction <add>, %14, %cst_6 [0] : vector<2x8x128xf32> to vector<8x128xf32>
    %16 = math.log %15 : vector<8x128xf32>
    %17 = arith.addf %10, %16 : vector<8x128xf32>
    %cst_7 = arith.constant dense<0xFF800000> : vector<128xf32>
    %18 = vector.multi_reduction <maximumf>, %17, %cst_7 [0] : vector<8x128xf32> to vector<128xf32>
    %19 = vector.shape_cast %18 : vector<128xf32> to vector<1x128xf32>
    %20 = vector.broadcast %19 : vector<1x128xf32> to vector<8x128xf32>
    %21 = arith.subf %17, %20 : vector<8x128xf32>
    %22 = math.exp %21 : vector<8x128xf32>
    %cst_8 = arith.constant dense<0.000000e+00> : vector<128xf32>
    %23 = vector.multi_reduction <add>, %22, %cst_8 [0] : vector<8x128xf32> to vector<128xf32>
    %24 = vector.shape_cast %23 : vector<128xf32> to vector<1x128xf32>
    %25 = math.log %24 : vector<1x128xf32>
    %26 = arith.addf %19, %25 : vector<1x128xf32>
    %27 = vector.broadcast %26 : vector<1x128xf32> to vector<8x128xf32>
    %28 = arith.subf %17, %27 : vector<8x128xf32>
    %29 = vector.extract_strided_slice %28 {offsets = [0, 0], sizes = [4, 128], strides = [1, 1]} : vector<8x128xf32> to vector<4x128xf32>
    %c0_9 = arith.constant 0 : index
    %c0_10 = arith.constant 0 : index
    %30 = vector.load %arg4[%c0_9, %c0_10] : memref<4x128xf32, #tpu.memory_space<vmem>>, vector<4x128xf32>
    tpu.vector_store %arg4[%c0_9, %c0_10], %29 {strides = array<i32>} : memref<4x128xf32, #tpu.memory_space<vmem>>, vector<4x128xf32>,
    return
  }
  func.func @transform_0(%arg0: i32) -> (i32, i32) {
    %c0_i32 = arith.constant 0 : i32
    %c0_i32_0 = arith.constant 0 : i32
    return %arg0, %c0_i32 : i32, i32
  }
  func.func @transform_1(%arg0: i32) -> (i32, i32) {
    %c0_i32 = arith.constant 0 : i32
    %c0_i32_0 = arith.constant 0 : i32
    %c0_i32_1 = arith.constant 0 : i32
    return %c0_i32, %c0_i32_0 : i32, i32
  }
  func.func @transform_2(%arg0: i32) -> (i32, i32) {
    %c0_i32 = arith.constant 0 : i32
    %c0_i32_0 = arith.constant 0 : i32
    %c0_i32_1 = arith.constant 0 : i32
    return %c0_i32, %c0_i32_0 : i32, i32
  }
  func.func @transform_3(%arg0: i32) -> (i32, i32) {
    %c0_i32 = arith.constant 0 : i32
    %c0_i32_0 = arith.constant 0 : i32
    return %c0_i32, %arg0 : i32, i32
  }
}

</mosaic_0001>

<bundles_post_ra>
// kernel: tpu_custom_call.1
= control target key start
LH: loop header
LB: loop body
LE: loop exit
PB: predicated region body
PF: predicated region fallthrough
CT: control target
= control target key end

     0   :  { %8 = vsyncpa [#allocation3], 0  ;;  %s402_s0 = inlined_call_operand.vmem [shape: f32[16,32], index: 0, kind: input, shape index: {}]   ;;  %s403_s1 = inlined_call_operand.hbm [shape: f32[16,64], index: 1, kind: input, shape index: {}]   ;;  %s404_s2 = inlined_call_operand.vmem [shape: f32[16,1], index: 2, kind: input, shape index: {}]   ;;  %s405_s3 = inlined_call_operand.hbm [shape: f32[4,16], index: 3, kind: output, shape index: {}]  }
   0x1   :  { %9 = vsyncpa [#allocation4], 0  ;;  %s315_s12 = smov [#allocation2]  }
   0x2   :  { %s17_s13 = sshll.u32 %s315_s12, 4  ;;  %s18_s13 = int_to_ptr.vmem [resolvable:$true] %s17_s13 }
   0x3   :  { %s279_s14 = scalar_lea.vmem %s18_s13, 256  ;;  %p284_p1 = scmp.lt.s32.totalorder %s18_s13, %s18_s13 }
   0x4   :  { %p280_p0 = scmp.ne.s32.totalorder %s18_s13, %s279_s14  ;;  %p285_p2 = scmp.lt.s32.totalorder %s279_s14, %s279_s14 }
   0x6   :  { %p286_p3 = por %p285_p2, %p284_p1 }
   0x8   :  { %p287_p4 = pnand %p286_p3, %p280_p0 }
   0xa   :  { %290 = shalt.err (!%p287_p4)
}
   0xb   :  { %s316_s15 = smov 128   ;;  %s317_s16 = smov 8  }
   0xc   :  { %23 = dma.hbm_to_vmem [thread:$0]  %s403_s1, 256, %s18_s13, [#allocation3], %s316_s15, %s316_s15, %s317_s16  }
   0xd   :  { %311 = dma.done.wait [#allocation3], 256  }
   0xe   :  { %312 = vsyncadd [#allocation3], 4294967040  ;;  %v29_v0 = vld [vmem:[%s402_s0] sm:$0xff]  ;;  %v30_v1 = vld [vmem:[%s402_s0 + $0x8] sm:$0xff]  ;;  %vm95_vm0 = vcmask 523264   ;;  %v318_v10 = vmov 0  }
   0xf   :  { %45 = vxpose.xlu0.b32.start [1/16] (narrow) %v29_v0, 32  ;;  %v31_v2 = vld [vmem:[%s402_s0 + $0x10] sm:$0xff]  ;;  %v32_v3 = vld [vmem:[%s402_s0 + $0x18] sm:$0xff]  ;;  %v33_v4 = vld [vmem:[%s402_s0 + $0x20] sm:$0xff]  ;;  %259 = vset.pattern.permute.xlu1 %v318_v10 }
  0x10   :  { %v34_v5 = vld [vmem:[%s402_s0 + $0x28] sm:$0xff]  ;;  %v35_v6 = vld [vmem:[%s402_s0 + $0x30] sm:$0xff]  ;;  %v81_v7 = vld [vmem:[#allocation2] sm:$0xff] }
  0x11   :  { %251 = vmatprep.mubr.msk.f32.mxu0 %vm95_vm0, %v81_v7  ;;  %v36_v8 = vld [vmem:[%s402_s0 + $0x38] sm:$0xff]  ;;  %v83_v9 = vld [vmem:[%s404_s2] sm:$0xff]  ;;  %v84_v11 = vld [vmem:[%s404_s2 + $0x8] sm:$0xff] }
  0x12   :  { %87 = vperm.xlu1 %259, %v83_v9   ;;  %v37_v12 = vld [vmem:[%s402_s0 + $0x40] sm:$0xff]  ;;  %v38_v13 = vld [vmem:[%s402_s0 + $0x48] sm:$0xff]  ;;  %v39_v14 = vld [vmem:[%s402_s0 + $0x50] sm:$0xff] }
  0x13   :  { %46 = vxpose.xlu0.b32.cont [2/16] (narrow) %v30_v1, 32  ;;  %v40_v15 = vld [vmem:[%s402_s0 + $0x58] sm:$0xff]  ;;  %v41_v16 = vld [vmem:[%s402_s0 + $0x60] sm:$0xff]  ;;  %v42_v17 = vld [vmem:[%s402_s0 + $0x68] sm:$0xff] }
  0x14   :  { %v43_v18 = vld [vmem:[%s402_s0 + $0x70] sm:$0xff]  ;;  %v44_v19 = vld [vmem:[%s402_s0 + $0x78] sm:$0xff]  ;;  %v82_v28 = vld [vmem:[#allocation2 + $0x8] sm:$0xff]  ;;  %s319_s0 = smov [#allocation5]  }
  0x15   :  { %s214_s26 = sshll.u32 %s319_s0, 4  ;;  %s215_s26 = int_to_ptr.vmem [resolvable:$true] %s214_s26 }
  0x16   :  { %92 = vperm.xlu1 %259, %v84_v11   ;;  %s291_s1 = scalar_lea.vmem %s215_s26, 64  ;;  %p296_p6 = scmp.lt.s32.totalorder %s215_s26, %s215_s26 }
  0x17   :  { %47 = vxpose.xlu0.b32.cont [3/16] (narrow) %v31_v2, 32  ;;  %p292_p5 = scmp.ne.s32.totalorder %s215_s26, %s291_s1  ;;  %p297_p7 = scmp.lt.s32.totalorder %s291_s1, %s291_s1 }
  0x19   :  { %p298_p8 = por %p297_p7, %p296_p6 }
  0x1b   :  { %48 = vxpose.xlu0.b32.cont [4/16] (narrow) %v32_v3, 32  ;;  %p299_p9 = pnand %p298_p8, %p292_p5 }
  0x1f   :  { %49 = vxpose.xlu0.b32.cont [5/16] (narrow) %v33_v4, 32 }
  0x23   :  { %50 = vxpose.xlu0.b32.cont [6/16] (narrow) %v34_v5, 32 }
  0x27   :  { %51 = vxpose.xlu0.b32.cont [7/16] (narrow) %v35_v6, 32 }
  0x2b   :  { %52 = vxpose.xlu0.b32.cont [8/16] (narrow) %v36_v8, 32 }
  0x2f   :  { %53 = vxpose.xlu0.b32.cont [9/16] (narrow) %v37_v12, 32 }
  0x33   :  { %54 = vxpose.xlu0.b32.cont [10/16] (narrow) %v38_v13, 32 }
  0x37   :  { %55 = vxpose.xlu0.b32.cont [11/16] (narrow) %v39_v14, 32 }
  0x3b   :  { %56 = vxpose.xlu0.b32.cont [12/16] (narrow) %v40_v15, 32 }
  0x3f   :  { %57 = vxpose.xlu0.b32.cont [13/16] (narrow) %v41_v16, 32 }
  0x43   :  { %58 = vxpose.xlu0.b32.cont [14/16] (narrow) %v42_v17, 32 }
  0x47   :  { %59 = vxpose.xlu0.b32.cont [15/16] (narrow) %v43_v18, 32 }
  0x4b   :  { %60 = vxpose.xlu0.b32.end [16/16] (narrow) %v44_v19, 32 }
  0x74   :  { %260 = vset.pattern.permute.xlu0 %v318_v10 }
  0x8b   :  { %v61_v20 = vpop.trf.xlu0 }
  0x8c   :  { %v77_v27 = vmul.f32 %v61_v20, %v61_v20 }
  0x8d   :  { %v88_v29 = vpop.permute.xlu1 %87 }
  0x8f   :  { %v62_v21 = vpop.trf.xlu0 }
  0x90   :  { %v78_v26 = vmul.f32 %v62_v21, %v62_v21 }
  0x91   :  { %v93_v31 = vpop.permute.xlu1 %92 }
  0x93   :  { %v63_v22 = vpop.trf.xlu0 }
  0x94   :  { %v79_v25 = vmul.f32 %v63_v22, %v63_v22 }
  0x97   :  { %v64_v23 = vpop.trf.xlu0 }
  0x98   :  { %235 = vmatprep.subr.mxu0 %v64_v23  ;;  %v80_v24 = vmul.f32 %v64_v23, %v64_v23 }
  0x99   :  { %236 = vmatpush3.msra.mxu0 %v64_v23 }
  0x9a   :  { %237 = vmatprep.subr.mxu0 %v63_v22 }
  0x9b   :  { %238 = vmatpush3.msra.mxu0 %v63_v22 }
  0x9c   :  { %239 = vmatprep.subr.mxu0 %v62_v21 }
  0x9d   :  { %240 = vmatpush3.msra.mxu0 %v62_v21 }
  0x9e   :  { %241 = vmatprep.subr.mxu0 %v61_v20 }
  0x9f   :  { %242 = vmatpush3.msra.mxu0 %v61_v20 }
  0xa0   :  { %243 = vmatprep.subr.mxu0 %v80_v24 }
  0xa1   :  { %244 = vmatpush3.msra.mxu0 %v80_v24 }
  0xa2   :  { %245 = vmatprep.subr.mxu0 %v79_v25 }
  0xa3   :  { %246 = vmatpush3.msra.mxu0 %v79_v25 }
  0xa4   :  { %247 = vmatprep.subr.mxu0 %v78_v26 }
  0xa5   :  { %248 = vmatpush3.msra.mxu0 %v78_v26 }
  0xa6   :  { %249 = vmatprep.subr.mxu0 %v77_v27 }
  0xa7   :  { %250 = vmatpush3.msra.mxu0 %v77_v27 }
  0xa8   :  { %252 = vmatmul.mubr.msk.f32.vlgmr.msra.gmra.mxu0 %vm95_vm0, %v82_v28 }
 0x168   :  { %v253_v30 = vpop.f32.mrf.mxu0 }
 0x169   :  { %v174_v33 = vadd.f32 %v253_v30, %v93_v31 }
 0x16a   :  { %v168_v32 = vpop.f32.mrf.mxu0 }
 0x16b   :  { %v169_v34 = vadd.f32 %v168_v32, %v88_v29 }
 0x16d   :  { %v177_v35 = vmax.f32 %v169_v34, %v174_v33 }
 0x16f   :  { %v178_v36 = vsub.f32 %v169_v34, %v177_v35  ;;  %v179_v37 = vsub.f32 %v174_v33, %v177_v35 }
 0x171   :  { %v180_v38 = vmul.f32 1.442695, %v178_v36  ;;  %v182_v39 = vmul.f32 1.442695, %v179_v37 }
 0x173   :  { %261 = vpow2.f32 %v180_v38 }
 0x174   :  { %263 = vpow2.f32 %v182_v39 }
 0x180   :  { %v262_v40 = vpop.eup %261 }
 0x181   :  { %v264_v41 = vpop.eup %263 }
 0x182   :  { %v184_v42 = vadd.f32 %v264_v41, %v262_v40 }
 0x184   :  { %265 = vlog2.f32 %v184_v42 }
 0x191   :  { %v266_v43 = vpop.eup %265 }
 0x192   :  { %v186_v44 = vmul.f32 0.6931472, %v266_v43 }
 0x194   :  { %v187_v45 = vadd.f32 %v186_v44, %v177_v35 }
 0x196   :  { %v188_v46 = vrot.slane %v187_v45, 4 }
 0x198   :  { %v189_v47 = vmax.f32 %v187_v45, %v188_v46 }
 0x19a   :  { %v190_v48 = vrot.slane %v189_v47, 2 }
 0x19c   :  { %v191_v49 = vmax.f32 %v189_v47, %v190_v48 }
 0x19e   :  { %v192_v50 = vrot.slane %v191_v49, 1 }
 0x1a0   :  { %v193_v51 = vmax.f32 %v191_v49, %v192_v50 }
 0x1a2   :  { %v194_v52 = vsub.f32 %v187_v45, %v193_v51 }
 0x1a4   :  { %v195_v53 = vmul.f32 1.442695, %v194_v52 }
 0x1a6   :  { %267 = vpow2.f32 %v195_v53 }
 0x1b3   :  { %v268_v54 = vpop.eup %267 }
 0x1b4   :  { %v197_v55 = vrot.slane %v268_v54, 4 }
 0x1b6   :  { %v198_v56 = vadd.f32 %v268_v54, %v197_v55 }
 0x1b8   :  { %v199_v57 = vrot.slane %v198_v56, 2 }
 0x1ba   :  { %v200_v58 = vadd.f32 %v199_v57, %v198_v56 }
 0x1bc   :  { %v201_v59 = vrot.slane %v200_v58, 1 }
 0x1be   :  { %v202_v60 = vadd.f32 %v201_v59, %v200_v58 }
 0x1c0   :  { %269 = vlog2.f32 %v202_v60 }
 0x1cd   :  { %v270_v61 = vpop.eup %269 }
 0x1ce   :  { %v204_v62 = vmul.f32 0.6931472, %v270_v61 }
 0x1d0   :  { %v205_v63 = vadd.f32 %v204_v62, %v193_v51 }
 0x1d2   :  { %v206_v0 = vsub.f32 %v187_v45, %v205_v63 }
 0x1d4   :  { %207 = vst [vmem:[#allocation5] sm:$0xf] %v206_v0 }
 0x1d5   :  { %302 = shalt.err (!%p299_p9)
}
 0x1d6   :  { %217 = dma.vmem_to_hbm [thread:$0]  %s215_s26, 64, %s405_s3, [#allocation4]  }
 0x1d7   :  { %313 = dma.done.wait [#allocation4], 64  }
 0x1d8   :  { %314 = vsyncadd [#allocation4], 4294967232 }
 0x1d9   :  { %221 = vsyncpa [#allocation3], 1 }
 0x1da   :  { %222 = vsyncpa [#allocation4], 1 }

</bundles_post_ra>
